<compile_context>
chip_gen: v6e
topology: v6e:2x2x1
jax: 0.10.0
libtpu: 0.0.40
codegen_flags: <defaults>
</compile_context>

<pallas_src>
import functools
import math

import jax
import jax.numpy as jnp
from jax.experimental import pallas as pl
from jax.experimental.pallas import tpu as pltpu


def _round_up(n, m):
    return ((n + m - 1) // m) * m


# ---------------------------------------------------------------------------
# Prologue: per row tile compute S = X @ W (bf16) and L = X @ W_loop + bias
# (f32).  Two separate dots -> no lane-misaligned slicing for arbitrary f_out.
# ---------------------------------------------------------------------------
def _proj_kernel(x_ref, w_ref, wl_ref, bias_ref, s_ref, l_ref):
    x = x_ref[...]
    s = jnp.dot(x, w_ref[...], preferred_element_type=jnp.float32)
    s_ref[...] = s.astype(s_ref.dtype)
    l_ref[...] = (jnp.dot(x, wl_ref[...], preferred_element_type=jnp.float32)
                  + bias_ref[...])


# ---------------------------------------------------------------------------
# Aggregation: out[i] = L[i] + sum_k adj[i, k] @ S[k]
# The f32 output block is the resident accumulator across the (inner) k axis.
# ---------------------------------------------------------------------------
def _agg_kernel(adj_ref, s_ref, l_ref, out_ref, *, tile_k, s_resident):
    k = pl.program_id(1)

    @pl.when(k == 0)
    def _init():
        # Self-loop term + bias folded straight into the accumulator init.
        out_ref[...] = l_ref[...]

    if s_resident:
        # S lives fully in VMEM (constant-index BlockSpec); slice the k-chunk.
        start = pl.multiple_of(k * tile_k, tile_k)
        s_blk = s_ref[pl.ds(start, tile_k), :]
    else:
        s_blk = s_ref[...]

    out_ref[...] += jnp.dot(adj_ref[...], s_blk,
                            preferred_element_type=jnp.float32)


def gconv_forward(x, adj, weight, loop_weight, bias=None, *,
                  tile_m=None, tile_k=None):
    """out = adj @ (x @ W) + x @ W_loop + bias  (dense adjacency on the MXU)."""
    N, f_in = x.shape
    f_out = weight.shape[1]
    assert adj.shape == (N, N)
    assert loop_weight.shape == (f_in, f_out)

    if bias is None:
        bias = jnp.zeros((f_out,), jnp.float32)

    # ---- tile selection (row tile decoupled from reduction tile) -----------
    if tile_m is None or tile_k is None:
        if N <= 512:
            # Small graph: one tile each way.
            tile_m = tile_k = _round_up(max(N, 1), 128)
        else:
            tile_m = 256
            # >=256-deep contraction for the v6e/v7x 256-wide MXU; 512 when it
            # does not inflate the padding.
            tile_k = 512 if _round_up(N, 256) % 512 == 0 else 256

    n_pad = _round_up(N, math.lcm(tile_m, tile_k))
    n_i = n_pad // tile_m
    n_k = n_pad // tile_k

    if n_pad != N:
        x = jnp.pad(x, ((0, n_pad - N), (0, 0)))
        adj = jnp.pad(adj, ((0, n_pad - N), (0, n_pad - N)))

    # bf16 operands for the MXU (native rate on v5e/v6e/v7x); f32 accumulation.
    x_b = x.astype(jnp.bfloat16)
    adj_b = adj.astype(jnp.bfloat16)
    w_b = weight.astype(jnp.bfloat16)
    wl_b = loop_weight.astype(jnp.bfloat16)
    bias2d = bias.reshape(1, f_out).astype(jnp.float32)

    # ---- stage 1: projection (computed exactly once) ------------------------
    pt = tile_k                       # divides n_pad by construction
    n_pt = n_pad // pt
    s_b, l_f = pl.pallas_call(
        _proj_kernel,
        out_shape=(jax.ShapeDtypeStruct((n_pad, f_out), jnp.bfloat16),
                   jax.ShapeDtypeStruct((n_pad, f_out), jnp.float32)),
        grid_spec=pltpu.PrefetchScalarGridSpec(
            num_scalar_prefetch=0,
            grid=(n_pt,),
            in_specs=[
                pl.BlockSpec((pt, f_in), lambda i: (i, 0)),       # X rows
                pl.BlockSpec((f_in, f_out), lambda i: (0, 0)),    # W
                pl.BlockSpec((f_in, f_out), lambda i: (0, 0)),    # W_loop
                pl.BlockSpec((1, f_out), lambda i: (0, 0)),       # bias
            ],
            out_specs=[pl.BlockSpec((pt, f_out), lambda i: (i, 0)),
                       pl.BlockSpec((pt, f_out), lambda i: (i, 0))],
        ),
        compiler_params=pltpu.CompilerParams(
            dimension_semantics=("parallel",)),
        cost_estimate=pl.CostEstimate(
            flops=4 * n_pad * f_in * f_out,
            transcendentals=0,
            bytes_accessed=(n_pad * f_in * 2 + 2 * f_in * f_out * 2
                            + n_pad * f_out * 2 + n_pad * f_out * 4)),
    )(x_b, w_b, wl_b, bias2d)

    # ---- stage 2: neighbourhood aggregation --------------------------------
    # Keep S fully resident in VMEM when it fits a conservative budget (safe
    # even against the v7x 32 MiB default scoped / 64 MiB physical VMEM, and
    # against the v5e 16 MiB default scoped limit, including double buffers).
    s_resident = (n_pad * f_out * 2) <= 4 * 1024 * 1024
    if s_resident:
        s_spec = pl.BlockSpec((n_pad, f_out), lambda i, k: (0, 0))
    else:
        s_spec = pl.BlockSpec((tile_k, f_out), lambda i, k: (k, 0))

    agg = functools.partial(_agg_kernel, tile_k=tile_k, s_resident=s_resident)

    out = pl.pallas_call(
        agg,
        out_shape=jax.ShapeDtypeStruct((n_pad, f_out), jnp.float32),
        grid_spec=pltpu.PrefetchScalarGridSpec(
            num_scalar_prefetch=0,
            grid=(n_i, n_k),                     # (row tiles, reduction tiles)
            in_specs=[
                pl.BlockSpec((tile_m, tile_k), lambda i, k: (i, k)),   # adj
                s_spec,                                                # S
                pl.BlockSpec((tile_m, f_out), lambda i, k: (i, 0)),    # L
            ],
            out_specs=pl.BlockSpec((tile_m, f_out), lambda i, k: (i, 0)),
        ),
        compiler_params=pltpu.CompilerParams(
            dimension_semantics=("parallel", "arbitrary")),
        cost_estimate=pl.CostEstimate(
            flops=2 * n_pad * n_pad * f_out,
            transcendentals=0,
            bytes_accessed=(n_pad * n_pad * 2
                            + (1 if s_resident else n_i) * n_pad * f_out * 2
                            + 2 * n_pad * f_out * 4)),
    )(adj_b, s_b, l_f)

    return out[:N] if n_pad != N else out


def xavier_uniform(key, fan_in, fan_out):
    a = math.sqrt(6.0 / (fan_in + fan_out))
    return jax.random.uniform(key, (fan_in, fan_out), jnp.float32, -a, a)


def _make_inputs(key, n, f_in, f_out):
    k_x, k_adj, k_w, k_wl = jax.random.split(key, 4)
    x = jax.random.normal(k_x, (n, f_in), jnp.float32)
    # Deterministic synthetic (dense) adjacency: symmetric, row-normalized.
    a = (jax.random.uniform(k_adj, (n, n)) < 0.1).astype(jnp.float32)
    adj = a + a.T + jnp.eye(n, dtype=jnp.float32)
    adj = adj / jnp.maximum(adj.sum(axis=1, keepdims=True), 1.0)
    weight = xavier_uniform(k_w, f_in, f_out)
    loop_weight = xavier_uniform(k_wl, f_in, f_out)
    bias = jnp.zeros((f_out,), jnp.float32)
    return x, adj, weight, loop_weight, bias


def _check(x, adj, weight, loop_weight, bias):
    n, f_out = x.shape[0], weight.shape[1]
    out = jax.block_until_ready(gconv_forward(x, adj, weight, loop_weight, bias))
    assert out.shape == (n, f_out)

    # Reference 1: exact f32 semantics of the torch module (loose tolerance,
    # since the kernel streams bf16 operands with f32 accumulation).
    ref_f32 = adj @ (x @ weight) + x @ loop_weight + bias
    assert jnp.allclose(out, ref_f32, atol=5e-2, rtol=5e-2)

    # Reference 2: same bf16 cast points as the kernel (tight tolerance).
    xb = x.astype(jnp.bfloat16)
    ab = adj.astype(jnp.bfloat16)
    s = jnp.dot(xb, weight.astype(jnp.bfloat16),
                preferred_element_type=jnp.float32).astype(jnp.bfloat16)
    l = jnp.dot(xb, loop_weight.astype(jnp.bfloat16),
                preferred_element_type=jnp.float32) + bias
    ref_bf16 = jnp.dot(ab, s, preferred_element_type=jnp.float32) + l
    assert jnp.allclose(out, ref_bf16, atol=2e-3, rtol=2e-3)


if __name__ == "__main__":
    key = jax.random.PRNGKey(0)
    k1, k2 = jax.random.split(key)

    # Small shapes consistent with a GCN vertex matrix (N nodes, F features).
    _check(*_make_inputs(k1, 128, 64, 128))    # single-tile path

    # Multi-tile path: exercises the (i, k) grid, resident-S slicing and the
    # resident f32 accumulator across several reduction tiles (with padding).
    _check(*_make_inputs(k2, 640, 64, 128))

    print("KERNEL_OK")
</pallas_src>

<mosaic_0001>
module attributes {stable_mosaic.version = 11 : i64} {
  func.func @_proj_kernel(%arg0: i32, %arg1: memref<128x64xbf16, #tpu.memory_space<vmem>>, %arg2: memref<64x128xbf16, #tpu.memory_space<vmem>>, %arg3: memref<64x128xbf16, #tpu.memory_space<vmem>>, %arg4: memref<1x128xf32, #tpu.memory_space<vmem>>, %arg5: memref<128x128xbf16, #tpu.memory_space<vmem>>, %arg6: memref<128x128xf32, #tpu.memory_space<vmem>>) attributes {dimension_semantics = [#tpu.dimension_semantics<parallel>], iteration_bounds = array<i64: 1>, scalar_prefetch = 0 : i64, scratch_operands = 0 : i64, tpu.core_type = #tpu.core_type<tc>, window_params = [{transform_indices = @transform_0, window_bounds = array<i64: 128, 64>}, {pipeline_mode = #tpu.pipeline_mode<synchronous>, transform_indices = @transform_1, window_bounds = array<i64: 64, 128>}, {pipeline_mode = #tpu.pipeline_mode<synchronous>, transform_indices = @transform_2, window_bounds = array<i64: 64, 128>}, {pipeline_mode = #tpu.pipeline_mode<synchronous>, transform_indices = @transform_3, window_bounds = array<i64: 1, 128>}, {transform_indices = @transform_4, window_bounds = array<i64: 128, 128>}, {transform_indices = @transform_5, window_bounds = array<i64: 128, 128>}]} {
    %c0 = arith.constant 0 : index
    %c0_0 = arith.constant 0 : index
    %0 = vector.load %arg1[%c0, %c0_0] : memref<128x64xbf16, #tpu.memory_space<vmem>>, vector<128x64xbf16>
    %c0_1 = arith.constant 0 : index
    %c0_2 = arith.constant 0 : index
    %1 = vector.load %arg2[%c0_1, %c0_2] : memref<64x128xbf16, #tpu.memory_space<vmem>>, vector<64x128xbf16>
    %cst = arith.constant dense<0.000000e+00> : vector<128x128xf32>
    %2 = tpu.matmul %0, %1, %cst {dimension_numbers = #tpu.dot_dimension_numbers<[1], [0], [0], [1], [0, 0, 1, 1], [], []>} : vector<128x64xbf16>, vector<64x128xbf16>, vector<128x128xf32> -> vector<128x128xf32>
    %3 = arith.truncf %2 : vector<128x128xf32> to vector<128x128xbf16>
    %c0_3 = arith.constant 0 : index
    %c0_4 = arith.constant 0 : index
    %4 = vector.load %arg5[%c0_3, %c0_4] : memref<128x128xbf16, #tpu.memory_space<vmem>>, vector<128x128xbf16>
    tpu.vector_store %arg5[%c0_3, %c0_4], %3 {strides = array<i32>} : memref<128x128xbf16, #tpu.memory_space<vmem>>, vector<128x128xbf16>,
    %c0_5 = arith.constant 0 : index
    %c0_6 = arith.constant 0 : index
    %5 = vector.load %arg3[%c0_5, %c0_6] : memref<64x128xbf16, #tpu.memory_space<vmem>>, vector<64x128xbf16>
    %cst_7 = arith.constant dense<0.000000e+00> : vector<128x128xf32>
    %6 = tpu.matmul %0, %5, %cst_7 {dimension_numbers = #tpu.dot_dimension_numbers<[1], [0], [0], [1], [0, 0, 1, 1], [], []>} : vector<128x64xbf16>, vector<64x128xbf16>, vector<128x128xf32> -> vector<128x128xf32>
    %c0_8 = arith.constant 0 : index
    %c0_9 = arith.constant 0 : index
    %7 = vector.load %arg4[%c0_8, %c0_9] : memref<1x128xf32, #tpu.memory_space<vmem>>, vector<1x128xf32>
    %8 = vector.broadcast %7 : vector<1x128xf32> to vector<128x128xf32>
    %9 = arith.addf %6, %8 : vector<128x128xf32>
    %c0_10 = arith.constant 0 : index
    %c0_11 = arith.constant 0 : index
    %10 = vector.load %arg6[%c0_10, %c0_11] : memref<128x128xf32, #tpu.memory_space<vmem>>, vector<128x128xf32>
    tpu.vector_store %arg6[%c0_10, %c0_11], %9 {strides = array<i32>} : memref<128x128xf32, #tpu.memory_space<vmem>>, vector<128x128xf32>,
    return
  }
  func.func @transform_0(%arg0: i32) -> (i32, i32) {
    %c0_i32 = arith.constant 0 : i32
    %c0_i32_0 = arith.constant 0 : i32
    return %arg0, %c0_i32 : i32, i32
  }
  func.func @transform_1(%arg0: i32) -> (i32, i32) {
    %c0_i32 = arith.constant 0 : i32
    %c0_i32_0 = arith.constant 0 : i32
    %c0_i32_1 = arith.constant 0 : i32
    return %c0_i32, %c0_i32_0 : i32, i32
  }
  func.func @transform_2(%arg0: i32) -> (i32, i32) {
    %c0_i32 = arith.constant 0 : i32
    %c0_i32_0 = arith.constant 0 : i32
    %c0_i32_1 = arith.constant 0 : i32
    return %c0_i32, %c0_i32_0 : i32, i32
  }
  func.func @transform_3(%arg0: i32) -> (i32, i32) {
    %c0_i32 = arith.constant 0 : i32
    %c0_i32_0 = arith.constant 0 : i32
    %c0_i32_1 = arith.constant 0 : i32
    return %c0_i32, %c0_i32_0 : i32, i32
  }
  func.func @transform_4(%arg0: i32) -> (i32, i32) {
    %c0_i32 = arith.constant 0 : i32
    %c0_i32_0 = arith.constant 0 : i32
    return %arg0, %c0_i32 : i32, i32
  }
  func.func @transform_5(%arg0: i32) -> (i32, i32) {
    %c0_i32 = arith.constant 0 : i32
    %c0_i32_0 = arith.constant 0 : i32
    return %arg0, %c0_i32 : i32, i32
  }
}

</mosaic_0001>

<bundles_post_ra>
// kernel: tpu_custom_call.1
= control target key start
LH: loop header
LB: loop body
LE: loop exit
PB: predicated region body
PF: predicated region fallthrough
CT: control target
= control target key end

     0   :  { %11 = vsyncpa [#allocation3], 0  ;;  %vm110_vm0 = vcmask 523264   ;;  %s873_s0 = inlined_call_operand.vmem [shape: bf16[128,64], index: 0, kind: input, shape index: {}]   ;;  %s874_s1 = inlined_call_operand.vmem [shape: bf16[64,128], index: 1, kind: input, shape index: {}]   ;;  %s875_s2 = inlined_call_operand.vmem [shape: bf16[64,128], index: 2, kind: input, shape index: {}]   ;;  %s876_s3 = inlined_call_operand.vmem [shape: f32[1,128], index: 3, kind: input, shape index: {}]   ;;  %s877_s4 = inlined_call_operand.hbm [shape: bf16[128,128], index: 4, kind: output, shape index: {0}]   ;;  %s878_s5 = inlined_call_operand.hbm [shape: f32[128,128], index: 5, kind: output, shape index: {1}]  }
   0x1   :  { %v686_v0 = vld [vmem:[%s874_s1 + $0x18] sm:$0xff]   ;;  %v688_v2 = vld [vmem:[%s874_s1 + $0x10] sm:$0xff]   ;;  %v690_v4 = vld [vmem:[%s874_s1 + $0x8] sm:$0xff]  }
   0x2   :  { %v687_v1 = vld [vmem:[%s875_s2 + $0x18] sm:$0xff]   ;;  %632 = vmatprep.subr.bf16.mxu0 %v686_v0  ;;  %v689_v3 = vld [vmem:[%s875_s2 + $0x10] sm:$0xff]   ;;  %v691_v5 = vld [vmem:[%s875_s2 + $0x8] sm:$0xff]  }
   0x3   :  { %656 = vmatprep.subr.bf16.mxu1 %v687_v1  ;;  %633 = vmatpush3.bf16.msra.mxu0 %v686_v0  ;;  %v692_v6 = vld [vmem:[%s874_s1] sm:$0xff]   ;;  %v695_v9 = vld [vmem:[%s873_s0 + $0x8] sm:$0xff]   ;;  %v696_v10 = vld [vmem:[%s873_s0 + $0x10] sm:$0xff]  }
   0x4   :  { %657 = vmatpush3.bf16.msra.mxu1 %v687_v1  ;;  %634 = vmatprep.subr.bf16.mxu0 %v688_v2  ;;  %v694_v7 = vld [vmem:[%s873_s0] sm:$0xff]  }
   0x5   :  { %658 = vmatprep.subr.bf16.mxu1 %v689_v3  ;;  %v693_v8 = vld [vmem:[%s875_s2] sm:$0xff]   ;;  %640 = vmatprep.mubr.msk.bf16.mxu0 %vm110_vm0, %v694_v7 }
   0x6   :  { %664 = vmatprep.mubr.msk.bf16.mxu1 %vm110_vm0, %v694_v7 }
   0x7   :  { %635 = vmatpush3.bf16.msra.mxu0 %v688_v2 }
   0x8   :  { %659 = vmatpush3.bf16.msra.mxu1 %v689_v3  ;;  %636 = vmatprep.subr.bf16.mxu0 %v690_v4 }
   0x9   :  { %660 = vmatprep.subr.bf16.mxu1 %v691_v5 }
   0xb   :  { %637 = vmatpush3.bf16.msra.mxu0 %v690_v4 }
   0xc   :  { %661 = vmatpush3.bf16.msra.mxu1 %v691_v5  ;;  %638 = vmatprep.subr.bf16.mxu0 %v692_v6 }
   0xd   :  { %662 = vmatprep.subr.bf16.mxu1 %v693_v8 }
   0xf   :  { %639 = vmatpush3.bf16.msra.mxu0 %v692_v6 }
  0x10   :  { %663 = vmatpush3.bf16.msra.mxu1 %v693_v8 }
  0x11   :  { %12 = vsyncpa [#allocation5], 0  ;;  %v697_v11 = vld [vmem:[%s873_s0 + $0x18] sm:$0xff]   ;;  %v698_v12 = vld [vmem:[%s873_s0 + $0x20] sm:$0xff]   ;;  %s747_s25 = smov [#allocation4]  }
  0x12   :  { %641 = vmatmul.mubr.msk.bf16.vlgmr.msra.gmra.mxu0 %vm110_vm0, %v695_v9  ;;  %v699_v13 = vld [vmem:[%s873_s0 + $0x28] sm:$0xff]   ;;  %v700_v14 = vld [vmem:[%s873_s0 + $0x30] sm:$0xff]   ;;  %v701_v15 = vld [vmem:[%s873_s0 + $0x38] sm:$0xff]   ;;  %s746_s0 = smov [#allocation2]   ;;  %s481_s26 = sshll.u32 %s747_s25, 4  ;;  %s482_s26 = int_to_ptr.vmem [resolvable:$true] %s481_s26 }
  0x13   :  { %665 = vmatmul.mubr.msk.bf16.vlgmr.msra.gmra.mxu1 %vm110_vm0, %v695_v9  ;;  %644 = vmatprep.mubr.msk.bf16.mxu0 %vm110_vm0, %v696_v10  ;;  %v849_v16 = vld [vmem:[%s876_s3] ss:$0 sm:$0xff]  ;;  %s469_s3 = sshll.u32 %s746_s0, 4  ;;  %s470_s3 = int_to_ptr.vmem [resolvable:$true] %s469_s3 }
  0x14   :  { %668 = vmatprep.mubr.msk.bf16.mxu1 %vm110_vm0, %v696_v10  ;;  %s702_s27 = scalar_lea.vmem %s470_s3, 1024  ;;  %p707_p1 = scmp.lt.s32.totalorder %s470_s3, %s470_s3 }
  0x15   :  { %p703_p0 = scmp.ne.s32.totalorder %s470_s3, %s702_s27  ;;  %p708_p2 = scmp.lt.s32.totalorder %s702_s27, %s702_s27 }
  0x17   :  { %p709_p3 = por %p708_p2, %p707_p1 }
  0x19   :  { %p710_p4 = pnand %p709_p3, %p703_p0 }
  0x1a   :  { %645 = vmatmul.mubr.msk.bf16.gmra.mxu0 %vm110_vm0, %v697_v11 }
  0x1b   :  { %669 = vmatmul.mubr.msk.bf16.gmra.mxu1 %vm110_vm0, %v697_v11  ;;  %648 = vmatprep.mubr.msk.bf16.mxu0 %vm110_vm0, %v698_v12 }
  0x1c   :  { %672 = vmatprep.mubr.msk.bf16.mxu1 %vm110_vm0, %v698_v12 }
  0x22   :  { %649 = vmatmul.mubr.msk.bf16.gmra.mxu0 %vm110_vm0, %v699_v13 }
  0x23   :  { %673 = vmatmul.mubr.msk.bf16.gmra.mxu1 %vm110_vm0, %v699_v13  ;;  %652 = vmatprep.mubr.msk.bf16.mxu0 %vm110_vm0, %v700_v14 }
  0x24   :  { %676 = vmatprep.mubr.msk.bf16.mxu1 %vm110_vm0, %v700_v14 }
  0x2a   :  { %653 = vmatmul.mubr.msk.bf16.gmra.mxu0 %vm110_vm0, %v701_v15 }
  0x2b   :  { %677 = vmatmul.mubr.msk.bf16.gmra.mxu1 %vm110_vm0, %v701_v15 }
  0xd2   :  { %v642_v17 = vpop.f32.mrf.mxu0 }
  0xd3   :  { %v666_v18 = vpop.f32.mrf.mxu1 }
  0xd4   :  { %v394_v19 = vadd.f32 %v666_v18, %v849_v16  ;;  %v169_v20 = vpop.f32.mrf.mxu0 }
  0xd5   :  { %v385_v21 = vpop.f32.mrf.mxu1 }
  0xd6   :  { %450 = vst [vmem:[#allocation4 + $0x10] sm:$0xff] %v394_v19  ;;  %v386_v22 = vadd.f32 %v849_v16, %v385_v21  ;;  %v643_v23 = vpop.f32.mrf.mxu0 }
  0xd7   :  { %v569_v24 = vpack.c.bf16 %v643_v23, %v642_v17  ;;  %v667_v25 = vpop.f32.mrf.mxu1 }
  0xd8   :  { %448 = vst [vmem:[#allocation4] sm:$0xff] %v386_v22  ;;  %v397_v26 = vadd.f32 %v667_v25, %v849_v16  ;;  %v172_v27 = vpop.f32.mrf.mxu0 }
  0xd9   :  { %601 = vst [vmem:[#allocation2 + $0x8] sm:$0xff] %v569_v24   ;;  %v564_v28 = vpack.c.bf16 %v172_v27, %v169_v20  ;;  %v388_v29 = vpop.f32.mrf.mxu1 }
  0xda   :  { %451 = vst [vmem:[#allocation4 + $0x18] sm:$0xff] %v397_v26  ;;  %v389_v30 = vadd.f32 %v849_v16, %v388_v29  ;;  %v646_v31 = vpop.f32.mrf.mxu0 }
  0xdb   :  { %565 = vst [vmem:[#allocation2] sm:$0xff] %v564_v28   ;;  %v670_v32 = vpop.f32.mrf.mxu1 }
  0xdc   :  { %449 = vst [vmem:[#allocation4 + $0x8] sm:$0xff] %v389_v30  ;;  %v410_v33 = vadd.f32 %v670_v32, %v849_v16  ;;  %v185_v34 = vpop.f32.mrf.mxu0 }
  0xdd   :  { %v401_v35 = vpop.f32.mrf.mxu1 }
  0xde   :  { %454 = vst [vmem:[#allocation4 + $0x30] sm:$0xff] %v410_v33  ;;  %v402_v36 = vadd.f32 %v849_v16, %v401_v35  ;;  %v647_v37 = vpop.f32.mrf.mxu0 }
  0xdf   :  { %v579_v38 = vpack.c.bf16 %v647_v37, %v646_v31  ;;  %v671_v39 = vpop.f32.mrf.mxu1 }
  0xe0   :  { %452 = vst [vmem:[#allocation4 + $0x20] sm:$0xff] %v402_v36  ;;  %v413_v40 = vadd.f32 %v671_v39, %v849_v16  ;;  %v188_v41 = vpop.f32.mrf.mxu0 }
  0xe1   :  { %603 = vst [vmem:[#allocation2 + $0x18] sm:$0xff] %v579_v38   ;;  %v574_v42 = vpack.c.bf16 %v188_v41, %v185_v34  ;;  %v404_v43 = vpop.f32.mrf.mxu1 }
  0xe2   :  { %455 = vst [vmem:[#allocation4 + $0x38] sm:$0xff] %v413_v40  ;;  %v405_v44 = vadd.f32 %v849_v16, %v404_v43  ;;  %v650_v45 = vpop.f32.mrf.mxu0 }
  0xe3   :  { %602 = vst [vmem:[#allocation2 + $0x10] sm:$0xff] %v574_v42   ;;  %v674_v46 = vpop.f32.mrf.mxu1 }
  0xe4   :  { %453 = vst [vmem:[#allocation4 + $0x28] sm:$0xff] %v405_v44  ;;  %v426_v47 = vadd.f32 %v674_v46, %v849_v16  ;;  %v201_v48 = vpop.f32.mrf.mxu0 }
  0xe5   :  { %v417_v49 = vpop.f32.mrf.mxu1 }
  0xe6   :  { %458 = vst [vmem:[#allocation4 + $0x50] sm:$0xff] %v426_v47  ;;  %v418_v50 = vadd.f32 %v849_v16, %v417_v49  ;;  %v651_v51 = vpop.f32.mrf.mxu0 }
  0xe7   :  { %v589_v52 = vpack.c.bf16 %v651_v51, %v650_v45  ;;  %v675_v53 = vpop.f32.mrf.mxu1 }
  0xe8   :  { %456 = vst [vmem:[#allocation4 + $0x40] sm:$0xff] %v418_v50  ;;  %v429_v54 = vadd.f32 %v675_v53, %v849_v16  ;;  %v204_v55 = vpop.f32.mrf.mxu0 }
  0xe9   :  { %605 = vst [vmem:[#allocation2 + $0x28] sm:$0xff] %v589_v52   ;;  %v584_v56 = vpack.c.bf16 %v204_v55, %v201_v48  ;;  %v420_v57 = vpop.f32.mrf.mxu1 }
  0xea   :  { %459 = vst [vmem:[#allocation4 + $0x58] sm:$0xff] %v429_v54  ;;  %v421_v58 = vadd.f32 %v849_v16, %v420_v57  ;;  %v654_v59 = vpop.f32.mrf.mxu0 }
  0xeb   :  { %604 = vst [vmem:[#allocation2 + $0x20] sm:$0xff] %v584_v56   ;;  %v678_v60 = vpop.f32.mrf.mxu1 }
  0xec   :  { %457 = vst [vmem:[#allocation4 + $0x48] sm:$0xff] %v421_v58  ;;  %v442_v61 = vadd.f32 %v678_v60, %v849_v16  ;;  %v217_v62 = vpop.f32.mrf.mxu0 }
  0xed   :  { %v433_v63 = vpop.f32.mrf.mxu1 }
  0xee   :  { %462 = vst [vmem:[#allocation4 + $0x70] sm:$0xff] %v442_v61  ;;  %v434_v0 = vadd.f32 %v849_v16, %v433_v63  ;;  %v655_v1 = vpop.f32.mrf.mxu0 }
  0xef   :  { %v599_v2 = vpack.c.bf16 %v655_v1, %v654_v59  ;;  %v679_v3 = vpop.f32.mrf.mxu1 }
  0xf0   :  { %460 = vst [vmem:[#allocation4 + $0x60] sm:$0xff] %v434_v0  ;;  %v445_v4 = vadd.f32 %v679_v3, %v849_v16  ;;  %v220_v5 = vpop.f32.mrf.mxu0 }
  0xf1   :  { %607 = vst [vmem:[#allocation2 + $0x38] sm:$0xff] %v599_v2   ;;  %v594_v6 = vpack.c.bf16 %v220_v5, %v217_v62  ;;  %v436_v7 = vpop.f32.mrf.mxu1 }
  0xf2   :  { %463 = vst [vmem:[#allocation4 + $0x78] sm:$0xff] %v445_v4  ;;  %v437_v8 = vadd.f32 %v849_v16, %v436_v7 }
  0xf3   :  { %606 = vst [vmem:[#allocation2 + $0x30] sm:$0xff] %v594_v6  }
  0xf4   :  { %461 = vst [vmem:[#allocation4 + $0x68] sm:$0xff] %v437_v8 }
  0xf5   :  { %713 = shalt.err (!%p710_p4)
}
  0xf6   :  { %s748_s28 = smov 64   ;;  %s749_s29 = smov 4  }
  0xf7   :  { %475 = dma.vmem_to_hbm [thread:$0]  %s470_s3, 1024, %s877_s4, [#allocation3], %s748_s28, %s748_s28, %s749_s29  }
  0xf8   :  { %s722_s7 = scalar_lea.vmem %s482_s26, 2048  ;;  %p727_p6 = scmp.lt.s32.totalorder %s482_s26, %s482_s26 }
  0xf9   :  { %p723_p5 = scmp.ne.s32.totalorder %s482_s26, %s722_s7  ;;  %p728_p7 = scmp.lt.s32.totalorder %s722_s7, %s722_s7 }
  0xfb   :  { %p729_p8 = por %p728_p7, %p727_p6 }
  0xfd   :  { %p730_p9 = pnand %p729_p8, %p723_p5 }
  0xff   :  { %733 = shalt.err (!%p730_p9)
}
 0x100   :  { %s750_s8 = smov 128   ;;  %s751_s9 = smov 8  }
 0x101   :  { %487 = dma.vmem_to_hbm [thread:$0]  %s482_s26, 2048, %s878_s5, [#allocation5], %s750_s8, %s750_s8, %s751_s9  }
 0x102   :  { %742 = dma.done.wait [#allocation3], 1024  }
 0x103   :  { %743 = vsyncadd [#allocation3], 4294966272 }
 0x104   :  { %744 = dma.done.wait [#allocation5], 2048  }
 0x105   :  { %745 = vsyncadd [#allocation5], 4294965248 }
 0x106   :  { %494 = vsyncpa [#allocation3], 1 }
 0x107   :  { %495 = vsyncpa [#allocation5], 1 }

</bundles_post_ra>
